<compile_context>
chip_gen: v7x
topology: tpu7x:2x2x1
jax: 0.10.0
libtpu: 0.0.40
codegen_flags: <defaults>
</compile_context>

<pallas_src>
import jax
import jax.numpy as jnp
from jax.experimental import pallas as pl
from jax.experimental.pallas import tpu as pltpu


def _conv1x1_kernel(w_ref, x_ref, o_ref):
    # w_ref: (tile_cout, Cin)      -- one output-channel tile of the 1x1 weight
    #                                 (resident across the inner batch axis)
    # x_ref: (1, Cin, H*W)         -- activation slab for image b
    # o_ref: (1, tile_cout, H*W)   -- output tile, already in NCHW element order
    o_ref[0] = jnp.dot(
        w_ref[...], x_ref[0], preferred_element_type=jnp.float32
    ).astype(o_ref.dtype)


def _pick_cout_tile(cout: int, min_tiles: int = 2) -> int:
    """Largest multiple-of-8 divisor of `cout` giving >= min_tiles grid steps.

    min_tiles=2 -> tile_cout=672 for Cout=1344: one grid step per v7x
    TensorCore, and only 2 (cheap) steps on single-core v5e/v6e.
    """
    if cout % 8 != 0:
        return cout
    for t in range(cout, 7, -8):
        if cout % t == 0 and (cout // t) >= min_tiles:
            return t
    return cout


def conv2d_1x1(
    x_nchw: jax.Array,
    weight_oi11: jax.Array,
    *,
    cast_inputs_to_bf16: bool = False,
) -> jax.Array:
    """1x1 conv, stride 1, no bias. x: [N, Cin, H, W], weight: [Cout, Cin, 1, 1]."""
    n, cin, h, w = x_nchw.shape
    cout = weight_oi11.shape[0]
    hw = h * w
    out_dtype = x_nchw.dtype

    # Zero-cost reshapes only (no transposes anywhere).
    x3d = x_nchw.reshape(n, cin, hw)          # (N, Cin, H*W)
    w2d = weight_oi11.reshape(cout, cin)      # (Cout, Cin)

    if cast_inputs_to_bf16:
        # Halves the dominant input HBM traffic; accumulation stays f32 in-kernel.
        x3d = x3d.astype(jnp.bfloat16)
        w2d = w2d.astype(jnp.bfloat16)

    tile_cout = _pick_cout_tile(cout, min_tiles=2)
    # Outer axis = Cout tiles, inner axis = batch -> weight block index is
    # constant along the inner axis, so the weight tile stays resident across
    # all images (no per-image re-fetch of the 1.2 MB weight).
    grid = (cout // tile_cout, n)

    out3d = pl.pallas_call(
        _conv1x1_kernel,
        out_shape=jax.ShapeDtypeStruct((n, cout, hw), out_dtype),
        grid_spec=pltpu.PrefetchScalarGridSpec(
            num_scalar_prefetch=0,
            grid=grid,
            in_specs=[
                # Weight tile varies only with the Cout-tile axis (stationary
                # across batch).
                pl.BlockSpec((tile_cout, cin), lambda i, b: (i, 0)),
                # Activations for image b.
                pl.BlockSpec((1, cin, hw), lambda i, b: (b, 0, 0)),
            ],
            out_specs=pl.BlockSpec((1, tile_cout, hw), lambda i, b: (b, i, 0)),
        ),
        compiler_params=pltpu.CompilerParams(
            dimension_semantics=("parallel", "parallel"),
        ),
    )(w2d, x3d)

    # (N, Cout, H*W) -> (N, Cout, H, W): zero-cost reshape, already NCHW order.
    return out3d.reshape(n, cout, h, w)


if __name__ == "__main__":
    # Module fixes channel dims: Conv2d(224, 1344, kernel_size=1, bias=False),
    # input torch.Size([1, 224, 14, 14]).
    N, CIN, H, W = 1, 224, 14, 14
    COUT = 1344

    key = jax.random.PRNGKey(0)
    kx, kw = jax.random.split(key)
    x = jax.random.normal(kx, (N, CIN, H, W), dtype=jnp.float32)
    # Deterministic kaiming-ish init for the conv weight [Cout, Cin, 1, 1].
    weight = jax.random.normal(kw, (COUT, CIN, 1, 1), dtype=jnp.float32) * (
        1.0 / jnp.sqrt(CIN)
    )

    out = conv2d_1x1(x, weight)
    out = jax.block_until_ready(out)

    # Sanity check against a high-precision pure-JAX reference.
    ref = jnp.einsum(
        "nchw,oc->nohw",
        x,
        weight.reshape(COUT, CIN),
        precision=jax.lax.Precision.HIGHEST,
    )
    assert out.shape == (N, COUT, H, W), out.shape
    assert jnp.allclose(out, ref, atol=1e-2, rtol=1e-2), float(
        jnp.max(jnp.abs(out - ref))
    )

    print("KERNEL_OK")
</pallas_src>

<mosaic_0001>
module attributes {stable_mosaic.version = 11 : i64} {
  func.func @_conv1x1_kernel(%arg0: i32, %arg1: i32, %arg2: memref<672x224xf32, #tpu.memory_space<vmem>>, %arg3: memref<1x224x196xf32, #tpu.memory_space<vmem>>, %arg4: memref<1x672x196xf32, #tpu.memory_space<vmem>>) attributes {dimension_semantics = [#tpu.dimension_semantics<parallel>, #tpu.dimension_semantics<parallel>], iteration_bounds = array<i64: 2, 1>, scalar_prefetch = 0 : i64, scratch_operands = 0 : i64, tpu.core_type = #tpu.core_type<tc>, window_params = [{transform_indices = @transform_0, window_bounds = array<i64: 672, 224>}, {transform_indices = @transform_1, window_bounds = array<i64: 1, 224, 196>}, {transform_indices = @transform_2, window_bounds = array<i64: 1, 672, 196>}]} {
    %c0 = arith.constant 0 : index
    %c0_0 = arith.constant 0 : index
    %0 = vector.load %arg2[%c0, %c0_0] : memref<672x224xf32, #tpu.memory_space<vmem>>, vector<672x224xf32>
    %c0_1 = arith.constant 0 : index
    %c0_2 = arith.constant 0 : index
    %c0_3 = arith.constant 0 : index
    %1 = vector.load %arg3[%c0_1, %c0_2, %c0_3] : memref<1x224x196xf32, #tpu.memory_space<vmem>>, vector<1x224x196xf32>
    %2 = vector.shape_cast %1 : vector<1x224x196xf32> to vector<224x196xf32>
    %cst = arith.constant dense<0.000000e+00> : vector<672x196xf32>
    %3 = tpu.matmul %0, %2, %cst {dimension_numbers = #tpu.dot_dimension_numbers<[1], [0], [0], [1], [0, 0, 1, 1], [], []>} : vector<672x224xf32>, vector<224x196xf32>, vector<672x196xf32> -> vector<672x196xf32>
    %c0_4 = arith.constant 0 : index
    %c0_5 = arith.constant 0 : index
    %c0_6 = arith.constant 0 : index
    %4 = vector.load %arg4[%c0_4, %c0_5, %c0_6] : memref<1x672x196xf32, #tpu.memory_space<vmem>>, vector<1x672x196xf32>
    %5 = vector.shape_cast %4 : vector<1x672x196xf32> to vector<672x196xf32>
    %6 = vector.shape_cast %3 : vector<672x196xf32> to vector<1x672x196xf32>
    tpu.vector_store %arg4[%c0_4, %c0_5, %c0_6], %6 {strides = array<i32>} : memref<1x672x196xf32, #tpu.memory_space<vmem>>, vector<1x672x196xf32>,
    return
  }
  func.func @transform_0(%arg0: i32, %arg1: i32) -> (i32, i32) {
    %c0_i32 = arith.constant 0 : i32
    %c0_i32_0 = arith.constant 0 : i32
    return %arg0, %c0_i32 : i32, i32
  }
  func.func @transform_1(%arg0: i32, %arg1: i32) -> (i32, i32, i32) {
    %c0_i32 = arith.constant 0 : i32
    %c0_i32_0 = arith.constant 0 : i32
    %c0_i32_1 = arith.constant 0 : i32
    return %arg1, %c0_i32, %c0_i32_0 : i32, i32, i32
  }
  func.func @transform_2(%arg0: i32, %arg1: i32) -> (i32, i32, i32) {
    %c0_i32 = arith.constant 0 : i32
    %c0_i32_0 = arith.constant 0 : i32
    return %arg1, %arg0, %c0_i32 : i32, i32, i32
  }
}

</mosaic_0001>

<bundles_post_ra>
// kernel: tpu_custom_call.1
= control target key start
LH: loop header
LB: loop body
LE: loop exit
PB: predicated region body
PF: predicated region fallthrough
CT: control target
= control target key end

     0   :  { %s1756_s9 = smov 0   ;;  %s1758_s10 = smov 0   ;;  %s2475_s0 = inlined_call_operand.vmem [shape: f32[1344,224], index: 0, kind: input, shape index: {}]   ;;  %s2476_s1 = inlined_call_operand.vmem [shape: f32[1,224,196], index: 1, kind: input, shape index: {}]   ;;  %s2477_s2 = inlined_call_operand.vmem [shape: f32[1,1344,196], index: 2, kind: output, shape index: {}]  }
   0x1   :  { %s1760_s11 = smov 0  }
   0x2 LB: > { %s24_s12 = sadd.s32 1, %s1735_s10  ;;  %p1516_p0 = scmp.ge.s32.totalorder %s1739_s11, 1  ;;  %s1739_s11 = sphi %s1760_s11, %s12_s11   ;;  %s1735_s10 = sphi %s1758_s10, %s2479_s10   ;;  %s1731_s9 = sphi %s1756_s9, %s2478_s9  }
   0x3   : > { %p26_p1 = scmp.ge.s32.totalorder %s24_s12, 2  ;;  %p138_p2 = scmp.lt.s32.totalorder %s1739_s11, 3 }
   0x5   : > { %s2481_s12 = smov (%p26_p1, %s24_s12), 0  ;;  %p139_p3 = pnand %p1516_p0, %p138_p2 }
   0x6   : > { %v363_v0 = vld [vmem:[%s2476_s1 + $0x8] sm:$0xff] (!%p139_p3)  ;;  %v365_v1 = vld [vmem:[%s2476_s1 + $0x18] sm:$0xff] (!%p139_p3)  ;;  %v362_v2 = vld [vmem:[%s2476_s1] sm:$0xff] (!%p139_p3)  ;;  %s171_s19 = smul.u32 (!%p139_p3), 84, %s1731_s9  ;;  %vm418_vm0 = vcmask (!%p139_p3), 785408   ;;  %vm1241_vm1 = vcmask (!%p139_p3), 556032  }
   0x7   : > { %142 = sbr.rel (%p139_p3) target bundleno = 443 (0x1bb), region = 28  ;;  %v1609_v3 = vpack.c.bf16 (!%p139_p3), %v365_v1, %v363_v0  ;;  %v364_v4 = vld [vmem:[%s2476_s1 + $0x10] sm:$0xff] (!%p139_p3)  ;;  %v367_v5 = vld [vmem:[%s2476_s1 + $0x28] sm:$0xff] (!%p139_p3)  ;;  %v369_v6 = vld [vmem:[%s2476_s1 + $0x38] sm:$0xff] (!%p139_p3) }
   0x8   : > { %v1611_v7 = vpack.c.bf16 (!%p139_p3), %v364_v4, %v362_v2  ;;  %v1613_v8 = vpack.c.bf16 (!%p139_p3), %v369_v6, %v367_v5  ;;  %v366_v9 = vld [vmem:[%s2476_s1 + $0x20] sm:$0xff] (!%p139_p3)  ;;  %v368_v10 = vld [vmem:[%s2476_s1 + $0x30] sm:$0xff] (!%p139_p3)  ;;  %v371_v11 = vld [vmem:[%s2476_s1 + $0x48] sm:$0xff] (!%p139_p3)  ;;  %p172_p4 = scmp.lt.s32.totalorder (!%p139_p3), %s171_s19, 167 }
   0x9   : > { %1610 = vmatprep.subr.bf16.mxu0 (!%p139_p3), %v1609_v3  ;;  %1665 = vmatprep.subr.bf16.mxu1 (!%p139_p3), %v1609_v3  ;;  %v373_v12 = vld [vmem:[%s2476_s1 + $0x58] sm:$0xff] (!%p139_p3)  ;;  %v1615_v13 = vpack.c.bf16 (!%p139_p3), %v368_v10, %v366_v9  ;;  %v370_v15 = vld [vmem:[%s2476_s1 + $0x40] sm:$0xff] (!%p139_p3)  ;;  %v372_v16 = vld [vmem:[%s2476_s1 + $0x50] sm:$0xff] (!%p139_p3) }
   0xa   : > { %1612 = vmatpush1.bf16.msra.mxu0 (!%p139_p3), %v1611_v7  ;;  %1679 = vmatpush1.bf16.msra.mxu1 (!%p139_p3), %v1611_v7  ;;  %v1617_v14 = vpack.c.bf16 (!%p139_p3), %v373_v12, %v371_v11  ;;  %v375_v17 = vld [vmem:[%s2476_s1 + $0x68] sm:$0xff] (!%p139_p3)  ;;  %v377_v18 = vld [vmem:[%s2476_s1 + $0x78] sm:$0xff] (!%p139_p3)  ;;  %v1619_v19 = vpack.c.bf16 (!%p139_p3), %v372_v16, %v370_v15  ;;  %v374_v21 = vld [vmem:[%s2476_s1 + $0x60] sm:$0xff] (!%p139_p3) }
   0xb   : > { %1614 = vmatprep.subr.bf16.mxu0 (!%p139_p3), %v1613_v8  ;;  %1666 = vmatprep.subr.bf16.mxu1 (!%p139_p3), %v1613_v8  ;;  %v1621_v20 = vpack.c.bf16 (!%p139_p3), %v377_v18, %v375_v17  ;;  %v376_v22 = vld [vmem:[%s2476_s1 + $0x70] sm:$0xff] (!%p139_p3)  ;;  %v379_v23 = vld [vmem:[%s2476_s1 + $0x88] sm:$0xff] (!%p139_p3)  ;;  %v381_v24 = vld [vmem:[%s2476_s1 + $0x98] sm:$0xff] (!%p139_p3) }
   0xc   : > { %v1623_v25 = vpack.c.bf16 (!%p139_p3), %v376_v22, %v374_v21  ;;  %v1625_v26 = vpack.c.bf16 (!%p139_p3), %v381_v24, %v379_v23  ;;  %v378_v27 = vld [vmem:[%s2476_s1 + $0x80] sm:$0xff] (!%p139_p3)  ;;  %v380_v28 = vld [vmem:[%s2476_s1 + $0x90] sm:$0xff] (!%p139_p3)  ;;  %v383_v29 = vld [vmem:[%s2476_s1 + $0xa8] sm:$0xff] (!%p139_p3) }
   0xd   : > { %v385_v30 = vld [vmem:[%s2476_s1 + $0xb8] sm:$0xff] (!%p139_p3)  ;;  %v1627_v31 = vpack.c.bf16 (!%p139_p3), %v380_v28, %v378_v27  ;;  %v382_v33 = vld [vmem:[%s2476_s1 + $0xa0] sm:$0xff] (!%p139_p3)  ;;  %v384_v34 = vld [vmem:[%s2476_s1 + $0xb0] sm:$0xff] (!%p139_p3) }
   0xe   : > { %1616 = vmatpush1.bf16.msra.mxu0 %v1615_v13  ;;  %1680 = vmatpush1.bf16.msra.mxu1 %v1615_v13  ;;  %s2483_s19 = smov (!%p172_p4, %s171_s19), 167  ;;  %v1629_v32 = vpack.c.bf16 %v385_v30, %v383_v29  ;;  %v387_v35 = vld [vmem:[%s2476_s1 + $0xc8] sm:$0xff]  ;;  %v389_v36 = vld [vmem:[%s2476_s1 + $0xd8] sm:$0xff]  ;;  %v1631_v39 = vpack.c.bf16 %v384_v34, %v382_v33  ;;  %v386_v41 = vld [vmem:[%s2476_s1 + $0xc0] sm:$0xff] }
   0xf   : > { %1618 = vmatprep.subr.bf16.mxu0 %v1617_v14  ;;  %1667 = vmatprep.subr.bf16.mxu1 %v1617_v14  ;;  %s1607_s26 = sshll.u32 %s2483_s19, 4  ;;  %v1633_v40 = vpack.c.bf16 %v389_v36, %v387_v35  ;;  %v388_v42 = vld [vmem:[%s2476_s1 + $0xd0] sm:$0xff]  ;;  %v391_v43 = vld [vmem:[%s2476_s1 + $0xe8] sm:$0xff]  ;;  %v393_v44 = vld [vmem:[%s2476_s1 + $0xf8] sm:$0xff] }
  0x10   : > { %s1851_s9 = scalar_lea.vmem %s2475_s0, %s1607_s26  ;;  %v1635_v45 = vpack.c.bf16 %v388_v42, %v386_v41  ;;  %v1637_v46 = vpack.c.bf16 %v393_v44, %v391_v43  ;;  %v390_v47 = vld [vmem:[%s2476_s1 + $0xe0] sm:$0xff]  ;;  %v392_v48 = vld [vmem:[%s2476_s1 + $0xf0] sm:$0xff]  ;;  %v395_v49 = vld [vmem:[%s2476_s1 + $0x108] sm:$0xff]  ;;  %s2212_s17 = scalar_lea.vmem %s2477_s2, %s1607_s26 }
  0x11   : > { %v195_v37 = vld [vmem:[%s1851_s9 + $0x8] sm:$0xff]  ;;  %v397_v50 = vld [vmem:[%s2476_s1 + $0x118] sm:$0xff]  ;;  %v1639_v51 = vpack.c.bf16 %v392_v48, %v390_v47  ;;  %v394_v53 = vld [vmem:[%s2476_s1 + $0x100] sm:$0xff] }
  0x12   : > { %1620 = vmatpush1.bf16.msra.mxu0 %v1619_v19  ;;  %1681 = vmatpush1.bf16.msra.mxu1 %v1619_v19  ;;  %v279_v38 = vld [vmem:[%s1851_s9 + $0x2a8] sm:$0xff]  ;;  %v1641_v52 = vpack.c.bf16 %v397_v50, %v395_v49  ;;  %v396_v54 = vld [vmem:[%s2476_s1 + $0x110] sm:$0xff]  ;;  %v401_v56 = vld [vmem:[%s2476_s1 + $0x138] sm:$0xff] }
  0x13   : > { %1622 = vmatprep.subr.bf16.mxu0 %v1621_v20  ;;  %1668 = vmatprep.subr.bf16.mxu1 %v1621_v20  ;;  %v399_v55 = vld [vmem:[%s2476_s1 + $0x128] sm:$0xff]  ;;  %v1643_v57 = vpack.c.bf16 %v396_v54, %v394_v53  ;;  %v398_v59 = vld [vmem:[%s2476_s1 + $0x120] sm:$0xff]  ;;  %v400_v60 = vld [vmem:[%s2476_s1 + $0x130] sm:$0xff] }
  0x14   : > { %1521 = vmatprep.mubr.msk.f32.mxu0 %vm418_vm0, %v195_v37  ;;  %1563 = vmatprep.mubr.msk.f32.mxu1 %vm418_vm0, %v279_v38  ;;  %v1645_v58 = vpack.c.bf16 %v401_v56, %v399_v55  ;;  %v403_v61 = vld [vmem:[%s2476_s1 + $0x148] sm:$0xff]  ;;  %v405_v62 = vld [vmem:[%s2476_s1 + $0x158] sm:$0xff]  ;;  %v1647_v63 = vpack.c.bf16 %v400_v60, %v398_v59  ;;  %v402_v1 = vld [vmem:[%s2476_s1 + $0x140] sm:$0xff] }
  0x15   : > { %v1649_v0 = vpack.c.bf16 %v405_v62, %v403_v61  ;;  %v404_v2 = vld [vmem:[%s2476_s1 + $0x150] sm:$0xff]  ;;  %v407_v3 = vld [vmem:[%s2476_s1 + $0x168] sm:$0xff]  ;;  %v409_v4 = vld [vmem:[%s2476_s1 + $0x178] sm:$0xff] }
  0x16   : > { %1624 = vmatpush1.bf16.msra.mxu0 %v1623_v25  ;;  %1682 = vmatpush1.bf16.msra.mxu1 %v1623_v25  ;;  %v1651_v5 = vpack.c.bf16 %v404_v2, %v402_v1  ;;  %v1653_v6 = vpack.c.bf16 %v409_v4, %v407_v3  ;;  %v406_v7 = vld [vmem:[%s2476_s1 + $0x160] sm:$0xff]  ;;  %v408_v8 = vld [vmem:[%s2476_s1 + $0x170] sm:$0xff]  ;;  %v411_v9 = vld [vmem:[%s2476_s1 + $0x188] sm:$0xff] }
  0x17   : > { %1626 = vmatprep.subr.bf16.mxu0 %v1625_v26  ;;  %1669 = vmatprep.subr.bf16.mxu1 %v1625_v26  ;;  %v413_v10 = vld [vmem:[%s2476_s1 + $0x198] sm:$0xff]  ;;  %v1655_v11 = vpack.c.bf16 %v408_v8, %v406_v7  ;;  %v410_v13 = vld [vmem:[%s2476_s1 + $0x180] sm:$0xff]  ;;  %v412_v14 = vld [vmem:[%s2476_s1 + $0x190] sm:$0xff] }
  0x18   : > { %v1657_v12 = vpack.c.bf16 %v413_v10, %v411_v9  ;;  %v415_v15 = vld [vmem:[%s2476_s1 + $0x1a8] sm:$0xff]  ;;  %v417_v16 = vld [vmem:[%s2476_s1 + $0x1b8] sm:$0xff]  ;;  %v1659_v17 = vpack.c.bf16 %v412_v14, %v410_v13  ;;  %v414_v19 = vld [vmem:[%s2476_s1 + $0x1a0] sm:$0xff] }
  0x19   : > { %v1661_v18 = vpack.c.bf16 %v417_v16, %v415_v15  ;;  %v416_v20 = vld [vmem:[%s2476_s1 + $0x1b0] sm:$0xff]  ;;  %v194_v22 = vld [vmem:[%s1851_s9] sm:$0xff]  ;;  %v197_v24 = vld [vmem:[%s1851_s9 + $0x18] sm:$0xff] }
  0x1a   : > { %1628 = vmatpush1.bf16.msra.mxu0 %v1627_v31  ;;  %1683 = vmatpush1.bf16.msra.mxu1 %v1627_v31  ;;  %v1663_v21 = vpack.c.bf16 %v416_v20, %v414_v19  ;;  %v278_v23 = vld [vmem:[%s1851_s9 + $0x2a0] sm:$0xff]  ;;  %v281_v25 = vld [vmem:[%s1851_s9 + $0x2b8] sm:$0xff]  ;;  %v196_v26 = vld [vmem:[%s1851_s9 + $0x10] sm:$0xff] }
  0x1b   : > { %1630 = vmatprep.subr.bf16.mxu0 %v1629_v32  ;;  %1670 = vmatprep.subr.bf16.mxu1 %v1629_v32  ;;  %v280_v27 = vld [vmem:[%s1851_s9 + $0x2b0] sm:$0xff]  ;;  %v199_v28 = vld [vmem:[%s1851_s9 + $0x28] sm:$0xff]  ;;  %v198_v30 = vld [vmem:[%s1851_s9 + $0x20] sm:$0xff] }
  0x1c   : > { %v283_v29 = vld [vmem:[%s1851_s9 + $0x2c8] sm:$0xff]  ;;  %v282_v31 = vld [vmem:[%s1851_s9 + $0x2c0] sm:$0xff]  ;;  %v201_v32 = vld [vmem:[%s1851_s9 + $0x38] sm:$0xff] }
  0x1d   : > { %v285_v33 = vld [vmem:[%s1851_s9 + $0x2d8] sm:$0xff]  ;;  %v200_v34 = vld [vmem:[%s1851_s9 + $0x30] sm:$0xff]  ;;  %v203_v36 = vld [vmem:[%s1851_s9 + $0x48] sm:$0xff] }
  0x1e   : > { %1632 = vmatpush1.bf16.msra.mxu0 %v1631_v39  ;;  %1684 = vmatpush1.bf16.msra.mxu1 %v1631_v39  ;;  %v284_v35 = vld [vmem:[%s1851_s9 + $0x2d0] sm:$0xff]  ;;  %v287_v37 = vld [vmem:[%s1851_s9 + $0x2e8] sm:$0xff]  ;;  %v202_v38 = vld [vmem:[%s1851_s9 + $0x40] sm:$0xff] }
  0x1f   : > { %1634 = vmatprep.subr.bf16.mxu0 %v1633_v40  ;;  %1671 = vmatprep.subr.bf16.mxu1 %v1633_v40  ;;  %v286_v39 = vld [vmem:[%s1851_s9 + $0x2e0] sm:$0xff]  ;;  %v205_v40 = vld [vmem:[%s1851_s9 + $0x58] sm:$0xff]  ;;  %v204_v42 = vld [vmem:[%s1851_s9 + $0x50] sm:$0xff] }
  0x20   : > { %v289_v41 = vld [vmem:[%s1851_s9 + $0x2f8] sm:$0xff]  ;;  %v288_v43 = vld [vmem:[%s1851_s9 + $0x2f0] sm:$0xff]  ;;  %v207_v44 = vld [vmem:[%s1851_s9 + $0x68] sm:$0xff] }
  0x21   : > { %v290_v47 = vld [vmem:[%s1851_s9 + $0x300] sm:$0xff]  ;;  %v209_v48 = vld [vmem:[%s1851_s9 + $0x78] sm:$0xff]  ;;  %v208_v50 = vld [vmem:[%s1851_s9 + $0x70] sm:$0xff] }
  0x22   : > { %1636 = vmatpush1.bf16.msra.mxu0 %v1635_v45  ;;  %1685 = vmatpush1.bf16.msra.mxu1 %v1635_v45  ;;  %v291_v45 = vld [vmem:[%s1851_s9 + $0x308] sm:$0xff]  ;;  %v293_v49 = vld [vmem:[%s1851_s9 + $0x318] sm:$0xff]  ;;  %v210_v54 = vld [vmem:[%s1851_s9 + $0x80] sm:$0xff] }
  0x23   : > { %1638 = vmatprep.subr.bf16.mxu0 %v1637_v46  ;;  %1672 = vmatprep.subr.bf16.mxu1 %v1637_v46  ;;  %v206_v46 = vld [vmem:[%s1851_s9 + $0x60] sm:$0xff]  ;;  %v295_v53 = vld [vmem:[%s1851_s9 + $0x328] sm:$0xff]  ;;  %v213_v56 = vld [vmem:[%s1851_s9 + $0x98] sm:$0xff] }
  0x24   : > { %v294_v55 = vld [vmem:[%s1851_s9 + $0x320] sm:$0xff]  ;;  %v296_v59 = vld [vmem:[%s1851_s9 + $0x330] sm:$0xff]  ;;  %v215_v60 = vld [vmem:[%s1851_s9 + $0xa8] sm:$0xff] }
  0x25   : > { %v299_v61 = vld [vmem:[%s1851_s9 + $0x348] sm:$0xff]  ;;  %v214_v62 = vld [vmem:[%s1851_s9 + $0xa0] sm:$0xff]  ;;  %v301_v1 = vld [vmem:[%s1851_s9 + $0x358] sm:$0xff] }
  0x26   : > { %1640 = vmatpush1.bf16.msra.mxu0 %v1639_v51  ;;  %1686 = vmatpush1.bf16.msra.mxu1 %v1639_v51  ;;  %v292_v51 = vld [vmem:[%s1851_s9 + $0x310] sm:$0xff]  ;;  %v219_v4 = vld [vmem:[%s1851_s9 + $0xc8] sm:$0xff]  ;;  %v302_v7 = vld [vmem:[%s1851_s9 + $0x360] sm:$0xff] }
  0x27   : > { %1642 = vmatprep.subr.bf16.mxu0 %v1641_v52  ;;  %1673 = vmatprep.subr.bf16.mxu1 %v1641_v52  ;;  %v211_v52 = vld [vmem:[%s1851_s9 + $0x88] sm:$0xff]  ;;  %v216_v2 = vld [vmem:[%s1851_s9 + $0xb0] sm:$0xff]  ;;  %v221_v8 = vld [vmem:[%s1851_s9 + $0xd8] sm:$0xff] }
  0x28   : > { %v300_v3 = vld [vmem:[%s1851_s9 + $0x350] sm:$0xff]  ;;  %v305_v9 = vld [vmem:[%s1851_s9 + $0x378] sm:$0xff]  ;;  %v307_v13 = vld [vmem:[%s1851_s9 + $0x388] sm:$0xff] }
  0x29   : > { %v220_v10 = vld [vmem:[%s1851_s9 + $0xd0] sm:$0xff]  ;;  %v222_v14 = vld [vmem:[%s1851_s9 + $0xe0] sm:$0xff]  ;;  %v225_v16 = vld [vmem:[%s1851_s9 + $0xf8] sm:$0xff] }
  0x2a   : > { %1644 = vmatpush1.bf16.msra.mxu0 %v1643_v57  ;;  %1687 = vmatpush1.bf16.msra.mxu1 %v1643_v57  ;;  %v297_v57 = vld [vmem:[%s1851_s9 + $0x338] sm:$0xff]  ;;  %v306_v15 = vld [vmem:[%s1851_s9 + $0x380] sm:$0xff]  ;;  %v308_v19 = vld [vmem:[%s1851_s9 + $0x390] sm:$0xff] }
  0x2b   : > { %1646 = vmatprep.subr.bf16.mxu0 %v1645_v58  ;;  %1674 = vmatprep.subr.bf16.mxu1 %v1645_v58  ;;  %v212_v58 = vld [vmem:[%s1851_s9 + $0x90] sm:$0xff]  ;;  %v227_v20 = vld [vmem:[%s1851_s9 + $0x108] sm:$0xff] }
  0x2e   : > { %1648 = vmatpush1.bf16.msra.mxu0 %v1647_v63  ;;  %1688 = vmatpush1.bf16.msra.mxu1 %v1647_v63  ;;  %v298_v63 = vld [vmem:[%s1851_s9 + $0x340] sm:$0xff] }
  0x2f   : > { %1650 = vmatprep.subr.bf16.mxu0 %v1649_v0  ;;  %1675 = vmatprep.subr.bf16.mxu1 %v1649_v0  ;;  %v217_v0 = vld [vmem:[%s1851_s9 + $0xb8] sm:$0xff] }
  0x32   : > { %1652 = vmatpush1.bf16.msra.mxu0 %v1651_v5  ;;  %1689 = vmatpush1.bf16.msra.mxu1 %v1651_v5  ;;  %v303_v5 = vld [vmem:[%s1851_s9 + $0x368] sm:$0xff] }
  0x33   : > { %1654 = vmatprep.subr.bf16.mxu0 %v1653_v6  ;;  %1676 = vmatprep.subr.bf16.mxu1 %v1653_v6  ;;  %v218_v6 = vld [vmem:[%s1851_s9 + $0xc0] sm:$0xff] }
  0x36   : > { %1656 = vmatpush1.bf16.msra.mxu0 %v1655_v11  ;;  %1690 = vmatpush1.bf16.msra.mxu1 %v1655_v11  ;;  %v304_v11 = vld [vmem:[%s1851_s9 + $0x370] sm:$0xff] }
  0x37   : > { %1658 = vmatprep.subr.bf16.mxu0 %v1657_v12  ;;  %1677 = vmatprep.subr.bf16.mxu1 %v1657_v12  ;;  %v223_v12 = vld [vmem:[%s1851_s9 + $0xe8] sm:$0xff] }
  0x3a   : > { %1660 = vmatpush1.bf16.msra.mxu0 %v1659_v17  ;;  %1691 = vmatpush1.bf16.msra.mxu1 %v1659_v17  ;;  %v309_v17 = vld [vmem:[%s1851_s9 + $0x398] sm:$0xff] }
  0x3b   : > { %1662 = vmatprep.subr.bf16.mxu0 %v1661_v18  ;;  %1678 = vmatprep.subr.bf16.mxu1 %v1661_v18  ;;  %v224_v18 = vld [vmem:[%s1851_s9 + $0xf0] sm:$0xff] }
  0x3e   : > { %1664 = vmatpush1.bf16.msra.mxu0 %v1663_v21  ;;  %1692 = vmatpush1.bf16.msra.mxu1 %v1663_v21  ;;  %v311_v21 = vld [vmem:[%s1851_s9 + $0x3a8] sm:$0xff] }
  0x41   : > { %736 = vmatmul.mubr.f32.vlgmr.msra.gmra.mrb[0].mxu0 %v194_v22  ;;  %988 = vmatmul.mubr.f32.vlgmr.msra.gmra.mrb[0].mxu1 %v278_v23  ;;  %v226_v22 = vld [vmem:[%s1851_s9 + $0x100] sm:$0xff] }
  0x42   : > { %1522 = vmatprep.mubr.msk.f32.mxu0 %vm418_vm0, %v197_v24  ;;  %1564 = vmatprep.mubr.msk.f32.mxu1 %vm418_vm0, %v281_v25  ;;  %v310_v23 = vld [vmem:[%s1851_s9 + $0x3a0] sm:$0xff]  ;;  %v229_v24 = vld [vmem:[%s1851_s9 + $0x118] sm:$0xff] }
  0x43   : > { %v313_v25 = vld [vmem:[%s1851_s9 + $0x3b8] sm:$0xff] }
  0x45   : > { %742 = vmatmul.mubr.f32.gmra.mrb[2].mxu0 %v196_v26  ;;  %994 = vmatmul.mubr.f32.gmra.mrb[2].mxu1 %v280_v27  ;;  %v228_v26 = vld [vmem:[%s1851_s9 + $0x110] sm:$0xff] }
  0x46   : > { %1523 = vmatprep.mubr.msk.f32.mxu0 %vm418_vm0, %v199_v28  ;;  %1565 = vmatprep.mubr.msk.f32.mxu1 %vm418_vm0, %v283_v29  ;;  %v312_v27 = vld [vmem:[%s1851_s9 + $0x3b0] sm:$0xff]  ;;  %v231_v28 = vld [vmem:[%s1851_s9 + $0x128] sm:$0xff] }
  0x47   : > { %v315_v29 = vld [vmem:[%s1851_s9 + $0x3c8] sm:$0xff] }
  0x49   : > { %748 = vmatmul.mubr.f32.gmra.mrb[4].mxu0 %v198_v30  ;;  %1000 = vmatmul.mubr.f32.gmra.mrb[4].mxu1 %v282_v31  ;;  %v230_v30 = vld [vmem:[%s1851_s9 + $0x120] sm:$0xff] }
  0x4a   : > { %1524 = vmatprep.mubr.msk.f32.mxu0 %vm418_vm0, %v201_v32  ;;  %1566 = vmatprep.mubr.msk.f32.mxu1 %vm418_vm0, %v285_v33  ;;  %v314_v31 = vld [vmem:[%s1851_s9 + $0x3c0] sm:$0xff]  ;;  %v233_v32 = vld [vmem:[%s1851_s9 + $0x138] sm:$0xff] }
  0x4b   : > { %v317_v33 = vld [vmem:[%s1851_s9 + $0x3d8] sm:$0xff] }
  0x4d   : > { %754 = vmatmul.mubr.f32.gmra.mrb[6].mxu0 %v200_v34  ;;  %1006 = vmatmul.mubr.f32.gmra.mrb[6].mxu1 %v284_v35  ;;  %v232_v34 = vld [vmem:[%s1851_s9 + $0x130] sm:$0xff] }
  0x4e   : > { %1525 = vmatprep.mubr.msk.f32.mxu0 %vm418_vm0, %v203_v36  ;;  %1567 = vmatprep.mubr.msk.f32.mxu1 %vm418_vm0, %v287_v37  ;;  %v316_v35 = vld [vmem:[%s1851_s9 + $0x3d0] sm:$0xff]  ;;  %v235_v36 = vld [vmem:[%s1851_s9 + $0x148] sm:$0xff] }
  0x4f   : > { %v319_v37 = vld [vmem:[%s1851_s9 + $0x3e8] sm:$0xff] }
  0x51   : > { %760 = vmatmul.mubr.f32.gmra.mrb[8].mxu0 %v202_v38  ;;  %1012 = vmatmul.mubr.f32.gmra.mrb[8].mxu1 %v286_v39  ;;  %v234_v38 = vld [vmem:[%s1851_s9 + $0x140] sm:$0xff] }
  0x52   : > { %1526 = vmatprep.mubr.msk.f32.mxu0 %vm418_vm0, %v205_v40  ;;  %1568 = vmatprep.mubr.msk.f32.mxu1 %vm418_vm0, %v289_v41  ;;  %v318_v39 = vld [vmem:[%s1851_s9 + $0x3e0] sm:$0xff]  ;;  %v237_v40 = vld [vmem:[%s1851_s9 + $0x158] sm:$0xff] }
  0x53   : > { %v321_v41 = vld [vmem:[%s1851_s9 + $0x3f8] sm:$0xff] }
  0x55   : > { %766 = vmatmul.mubr.f32.gmra.mrb[10].mxu0 %v204_v42  ;;  %1018 = vmatmul.mubr.f32.gmra.mrb[10].mxu1 %v288_v43  ;;  %v236_v42 = vld [vmem:[%s1851_s9 + $0x150] sm:$0xff] }
  0x56   : > { %1527 = vmatprep.mubr.msk.f32.mxu0 %vm418_vm0, %v207_v44  ;;  %1569 = vmatprep.mubr.msk.f32.mxu1 %vm418_vm0, %v291_v45  ;;  %v320_v43 = vld [vmem:[%s1851_s9 + $0x3f0] sm:$0xff]  ;;  %v239_v44 = vld [vmem:[%s1851_s9 + $0x168] sm:$0xff] }
  0x57   : > { %v323_v45 = vld [vmem:[%s1851_s9 + $0x408] sm:$0xff] }
  0x59   : > { %772 = vmatmul.mubr.f32.gmra.mrb[12].mxu0 %v206_v46  ;;  %1024 = vmatmul.mubr.f32.gmra.mrb[12].mxu1 %v290_v47  ;;  %v238_v46 = vld [vmem:[%s1851_s9 + $0x160] sm:$0xff] }
  0x5a   : > { %1528 = vmatprep.mubr.msk.f32.mxu0 %vm418_vm0, %v209_v48  ;;  %1570 = vmatprep.mubr.msk.f32.mxu1 %vm418_vm0, %v293_v49  ;;  %v322_v47 = vld [vmem:[%s1851_s9 + $0x400] sm:$0xff]  ;;  %v241_v48 = vld [vmem:[%s1851_s9 + $0x178] sm:$0xff] }
  0x5b   : > { %v325_v49 = vld [vmem:[%s1851_s9 + $0x418] sm:$0xff] }
  0x5d   : > { %778 = vmatmul.mubr.f32.gmra.mrb[14].mxu0 %v208_v50  ;;  %1030 = vmatmul.mubr.f32.gmra.mrb[14].mxu1 %v292_v51  ;;  %v240_v50 = vld [vmem:[%s1851_s9 + $0x170] sm:$0xff] }
  0x5e   : > { %1529 = vmatprep.mubr.msk.f32.mxu0 %vm418_vm0, %v211_v52  ;;  %1571 = vmatprep.mubr.msk.f32.mxu1 %vm418_vm0, %v295_v53  ;;  %v324_v51 = vld [vmem:[%s1851_s9 + $0x410] sm:$0xff]  ;;  %v243_v52 = vld [vmem:[%s1851_s9 + $0x188] sm:$0xff] }
  0x5f   : > { %v327_v53 = vld [vmem:[%s1851_s9 + $0x428] sm:$0xff] }
  0x61   : > { %784 = vmatmul.mubr.f32.gmra.mrb[16].mxu0 %v210_v54  ;;  %1036 = vmatmul.mubr.f32.gmra.mrb[16].mxu1 %v294_v55  ;;  %v242_v54 = vld [vmem:[%s1851_s9 + $0x180] sm:$0xff] }
  0x62   : > { %1530 = vmatprep.mubr.msk.f32.mxu0 %vm418_vm0, %v213_v56  ;;  %1572 = vmatprep.mubr.msk.f32.mxu1 %vm418_vm0, %v297_v57  ;;  %v326_v55 = vld [vmem:[%s1851_s9 + $0x420] sm:$0xff]  ;;  %v245_v56 = vld [vmem:[%s1851_s9 + $0x198] sm:$0xff] }
  0x63   : > { %v329_v57 = vld [vmem:[%s1851_s9 + $0x438] sm:$0xff] }
  0x65   : > { %790 = vmatmul.mubr.f32.gmra.mrb[18].mxu0 %v212_v58  ;;  %1042 = vmatmul.mubr.f32.gmra.mrb[18].mxu1 %v296_v59  ;;  %v244_v58 = vld [vmem:[%s1851_s9 + $0x190] sm:$0xff] }
  0x66   : > { %1531 = vmatprep.mubr.msk.f32.mxu0 %vm418_vm0, %v215_v60  ;;  %1573 = vmatprep.mubr.msk.f32.mxu1 %vm418_vm0, %v299_v61  ;;  %v328_v59 = vld [vmem:[%s1851_s9 + $0x430] sm:$0xff]  ;;  %v247_v60 = vld [vmem:[%s1851_s9 + $0x1a8] sm:$0xff] }
  0x67   : > { %v331_v61 = vld [vmem:[%s1851_s9 + $0x448] sm:$0xff] }
  0x69   : > { %796 = vmatmul.mubr.f32.gmra.mrb[20].mxu0 %v214_v62  ;;  %1048 = vmatmul.mubr.f32.gmra.mrb[20].mxu1 %v298_v63  ;;  %v246_v62 = vld [vmem:[%s1851_s9 + $0x1a0] sm:$0xff] }
  0x6a   : > { %1532 = vmatprep.mubr.msk.f32.mxu0 %vm418_vm0, %v217_v0  ;;  %1574 = vmatprep.mubr.msk.f32.mxu1 %vm418_vm0, %v301_v1  ;;  %v330_v63 = vld [vmem:[%s1851_s9 + $0x440] sm:$0xff]  ;;  %v249_v0 = vld [vmem:[%s1851_s9 + $0x1b8] sm:$0xff] }
  0x6b   : > { %v333_v1 = vld [vmem:[%s1851_s9 + $0x458] sm:$0xff] }
  0x6d   : > { %802 = vmatmul.mubr.f32.gmra.mrb[22].mxu0 %v216_v2  ;;  %1054 = vmatmul.mubr.f32.gmra.mrb[22].mxu1 %v300_v3  ;;  %v248_v2 = vld [vmem:[%s1851_s9 + $0x1b0] sm:$0xff] }
  0x6e   : > { %1533 = vmatprep.mubr.msk.f32.mxu0 %vm418_vm0, %v219_v4  ;;  %1575 = vmatprep.mubr.msk.f32.mxu1 %vm418_vm0, %v303_v5  ;;  %v332_v3 = vld [vmem:[%s1851_s9 + $0x450] sm:$0xff]  ;;  %v251_v4 = vld [vmem:[%s1851_s9 + $0x1c8] sm:$0xff] }
  0x6f   : > { %v335_v5 = vld [vmem:[%s1851_s9 + $0x468] sm:$0xff] }
  0x71   : > { %808 = vmatmul.mubr.f32.gmra.mrb[24].mxu0 %v218_v6  ;;  %1060 = vmatmul.mubr.f32.gmra.mrb[24].mxu1 %v302_v7  ;;  %v250_v6 = vld [vmem:[%s1851_s9 + $0x1c0] sm:$0xff] }
  0x72   : > { %1534 = vmatprep.mubr.msk.f32.mxu0 %vm418_vm0, %v221_v8  ;;  %1576 = vmatprep.mubr.msk.f32.mxu1 %vm418_vm0, %v305_v9  ;;  %v334_v7 = vld [vmem:[%s1851_s9 + $0x460] sm:$0xff]  ;;  %v253_v8 = vld [vmem:[%s1851_s9 + $0x1d8] sm:$0xff] }
  0x73   : > { %v337_v9 = vld [vmem:[%s1851_s9 + $0x478] sm:$0xff] }
  0x75   : > { %814 = vmatmul.mubr.f32.gmra.mrb[26].mxu0 %v220_v10  ;;  %1066 = vmatmul.mubr.f32.gmra.mrb[26].mxu1 %v304_v11  ;;  %v252_v10 = vld [vmem:[%s1851_s9 + $0x1d0] sm:$0xff] }
  0x76   : > { %1535 = vmatprep.mubr.msk.f32.mxu0 %vm418_vm0, %v223_v12  ;;  %1577 = vmatprep.mubr.msk.f32.mxu1 %vm418_vm0, %v307_v13  ;;  %v336_v11 = vld [vmem:[%s1851_s9 + $0x470] sm:$0xff]  ;;  %v255_v12 = vld [vmem:[%s1851_s9 + $0x1e8] sm:$0xff] }
  0x77   : > { %v339_v13 = vld [vmem:[%s1851_s9 + $0x488] sm:$0xff] }
  0x79   : > { %820 = vmatmul.mubr.f32.gmra.mrb[28].mxu0 %v222_v14  ;;  %1072 = vmatmul.mubr.f32.gmra.mrb[28].mxu1 %v306_v15  ;;  %v254_v14 = vld [vmem:[%s1851_s9 + $0x1e0] sm:$0xff] }
  0x7a   : > { %1536 = vmatprep.mubr.msk.f32.mxu0 %vm418_vm0, %v225_v16  ;;  %1578 = vmatprep.mubr.msk.f32.mxu1 %vm418_vm0, %v309_v17  ;;  %v338_v15 = vld [vmem:[%s1851_s9 + $0x480] sm:$0xff]  ;;  %v257_v16 = vld [vmem:[%s1851_s9 + $0x1f8] sm:$0xff] }
  0x7b   : > { %v341_v17 = vld [vmem:[%s1851_s9 + $0x498] sm:$0xff] }
  0x7d   : > { %826 = vmatmul.mubr.f32.gmra.mrb[30].mxu0 %v224_v18  ;;  %1078 = vmatmul.mubr.f32.gmra.mrb[30].mxu1 %v308_v19  ;;  %v256_v18 = vld [vmem:[%s1851_s9 + $0x1f0] sm:$0xff] }
  0x7e   : > { %1537 = vmatprep.mubr.msk.f32.mxu0 %vm418_vm0, %v227_v20  ;;  %1579 = vmatprep.mubr.msk.f32.mxu1 %vm418_vm0, %v311_v21  ;;  %v340_v19 = vld [vmem:[%s1851_s9 + $0x490] sm:$0xff]  ;;  %v259_v20 = vld [vmem:[%s1851_s9 + $0x208] sm:$0xff] }
  0x7f   : > { %v343_v21 = vld [vmem:[%s1851_s9 + $0x4a8] sm:$0xff] }
  0x81   : > { %832 = vmatmul.mubr.f32.gmra.mrb[32].mxu0 %v226_v22  ;;  %1084 = vmatmul.mubr.f32.gmra.mrb[32].mxu1 %v310_v23  ;;  %v258_v22 = vld [vmem:[%s1851_s9 + $0x200] sm:$0xff] }
  0x82   : > { %1538 = vmatprep.mubr.msk.f32.mxu0 %vm418_vm0, %v229_v24  ;;  %1580 = vmatprep.mubr.msk.f32.mxu1 %vm418_vm0, %v313_v25  ;;  %v342_v23 = vld [vmem:[%s1851_s9 + $0x4a0] sm:$0xff]  ;;  %v261_v24 = vld [vmem:[%s1851_s9 + $0x218] sm:$0xff] }
  0x83   : > { %v345_v25 = vld [vmem:[%s1851_s9 + $0x4b8] sm:$0xff] }
  0x85   : > { %838 = vmatmul.mubr.f32.gmra.mrb[34].mxu0 %v228_v26  ;;  %1090 = vmatmul.mubr.f32.gmra.mrb[34].mxu1 %v312_v27  ;;  %v260_v26 = vld [vmem:[%s1851_s9 + $0x210] sm:$0xff] }
  0x86   : > { %1539 = vmatprep.mubr.msk.f32.mxu0 %vm418_vm0, %v231_v28  ;;  %1581 = vmatprep.mubr.msk.f32.mxu1 %vm418_vm0, %v315_v29  ;;  %v344_v27 = vld [vmem:[%s1851_s9 + $0x4b0] sm:$0xff]  ;;  %v263_v28 = vld [vmem:[%s1851_s9 + $0x228] sm:$0xff] }
  0x87   : > { %v347_v29 = vld [vmem:[%s1851_s9 + $0x4c8] sm:$0xff] }
  0x89   : > { %844 = vmatmul.mubr.f32.gmra.mrb[36].mxu0 %v230_v30  ;;  %1096 = vmatmul.mubr.f32.gmra.mrb[36].mxu1 %v314_v31  ;;  %v262_v30 = vld [vmem:[%s1851_s9 + $0x220] sm:$0xff] }
  0x8a   : > { %1540 = vmatprep.mubr.msk.f32.mxu0 %vm418_vm0, %v233_v32  ;;  %1582 = vmatprep.mubr.msk.f32.mxu1 %vm418_vm0, %v317_v33  ;;  %v346_v31 = vld [vmem:[%s1851_s9 + $0x4c0] sm:$0xff]  ;;  %v265_v32 = vld [vmem:[%s1851_s9 + $0x238] sm:$0xff] }
  0x8b   : > { %v349_v33 = vld [vmem:[%s1851_s9 + $0x4d8] sm:$0xff] }
  0x8d   : > { %850 = vmatmul.mubr.f32.gmra.mrb[38].mxu0 %v232_v34  ;;  %1102 = vmatmul.mubr.f32.gmra.mrb[38].mxu1 %v316_v35  ;;  %v264_v34 = vld [vmem:[%s1851_s9 + $0x230] sm:$0xff] }
  0x8e   : > { %1541 = vmatprep.mubr.msk.f32.mxu0 %vm418_vm0, %v235_v36  ;;  %1583 = vmatprep.mubr.msk.f32.mxu1 %vm418_vm0, %v319_v37  ;;  %v348_v35 = vld [vmem:[%s1851_s9 + $0x4d0] sm:$0xff]  ;;  %v267_v36 = vld [vmem:[%s1851_s9 + $0x248] sm:$0xff] }
  0x8f   : > { %v351_v37 = vld [vmem:[%s1851_s9 + $0x4e8] sm:$0xff] }
  0x91   : > { %856 = vmatmul.mubr.f32.gmra.mrb[40].mxu0 %v234_v38  ;;  %1108 = vmatmul.mubr.f32.gmra.mrb[40].mxu1 %v318_v39  ;;  %v266_v38 = vld [vmem:[%s1851_s9 + $0x240] sm:$0xff] }
  0x92   : > { %1542 = vmatprep.mubr.msk.f32.mxu0 %vm418_vm0, %v237_v40  ;;  %1584 = vmatprep.mubr.msk.f32.mxu1 %vm418_vm0, %v321_v41  ;;  %v350_v39 = vld [vmem:[%s1851_s9 + $0x4e0] sm:$0xff]  ;;  %v269_v40 = vld [vmem:[%s1851_s9 + $0x258] sm:$0xff] }
  0x93   : > { %v353_v41 = vld [vmem:[%s1851_s9 + $0x4f8] sm:$0xff] }
  0x95   : > { %862 = vmatmul.mubr.f32.gmra.mrb[42].mxu0 %v236_v42  ;;  %1114 = vmatmul.mubr.f32.gmra.mrb[42].mxu1 %v320_v43  ;;  %v268_v42 = vld [vmem:[%s1851_s9 + $0x250] sm:$0xff] }
  0x96   : > { %1543 = vmatprep.mubr.msk.f32.mxu0 %vm418_vm0, %v239_v44  ;;  %1585 = vmatprep.mubr.msk.f32.mxu1 %vm418_vm0, %v323_v45  ;;  %v352_v43 = vld [vmem:[%s1851_s9 + $0x4f0] sm:$0xff]  ;;  %v271_v44 = vld [vmem:[%s1851_s9 + $0x268] sm:$0xff] }
  0x97   : > { %v355_v45 = vld [vmem:[%s1851_s9 + $0x508] sm:$0xff] }
  0x99   : > { %868 = vmatmul.mubr.f32.gmra.mrb[44].mxu0 %v238_v46  ;;  %1120 = vmatmul.mubr.f32.gmra.mrb[44].mxu1 %v322_v47  ;;  %v270_v46 = vld [vmem:[%s1851_s9 + $0x260] sm:$0xff] }
  0x9a   : > { %1544 = vmatprep.mubr.msk.f32.mxu0 %vm418_vm0, %v241_v48  ;;  %1586 = vmatprep.mubr.msk.f32.mxu1 %vm418_vm0, %v325_v49  ;;  %v354_v47 = vld [vmem:[%s1851_s9 + $0x500] sm:$0xff]  ;;  %v273_v48 = vld [vmem:[%s1851_s9 + $0x278] sm:$0xff] }
  0x9b   : > { %v357_v49 = vld [vmem:[%s1851_s9 + $0x518] sm:$0xff] }
  0x9d   : > { %874 = vmatmul.mubr.f32.gmra.mrb[46].mxu0 %v240_v50  ;;  %1126 = vmatmul.mubr.f32.gmra.mrb[46].mxu1 %v324_v51  ;;  %v272_v50 = vld [vmem:[%s1851_s9 + $0x270] sm:$0xff] }
  0x9e   : > { %1545 = vmatprep.mubr.msk.f32.mxu0 %vm418_vm0, %v243_v52  ;;  %1587 = vmatprep.mubr.msk.f32.mxu1 %vm418_vm0, %v327_v53  ;;  %v356_v51 = vld [vmem:[%s1851_s9 + $0x510] sm:$0xff]  ;;  %v275_v52 = vld [vmem:[%s1851_s9 + $0x288] sm:$0xff] }
  0x9f   : > { %v359_v53 = vld [vmem:[%s1851_s9 + $0x528] sm:$0xff] }
  0xa1   : > { %880 = vmatmul.mubr.f32.gmra.mrb[48].mxu0 %v242_v54  ;;  %1132 = vmatmul.mubr.f32.gmra.mrb[48].mxu1 %v326_v55  ;;  %v274_v54 = vld [vmem:[%s1851_s9 + $0x280] sm:$0xff] }
  0xa2   : > { %1546 = vmatprep.mubr.msk.f32.mxu0 %vm418_vm0, %v245_v56  ;;  %1588 = vmatprep.mubr.msk.f32.mxu1 %vm418_vm0, %v329_v57  ;;  %v358_v55 = vld [vmem:[%s1851_s9 + $0x520] sm:$0xff]  ;;  %v277_v56 = vld [vmem:[%s1851_s9 + $0x298] sm:$0xff] }
  0xa3   : > { %v361_v57 = vld [vmem:[%s1851_s9 + $0x538] sm:$0xff] }
  0xa5   : > { %886 = vmatmul.mubr.f32.gmra.mrb[50].mxu0 %v244_v58  ;;  %1138 = vmatmul.mubr.f32.gmra.mrb[50].mxu1 %v328_v59  ;;  %v276_v58 = vld [vmem:[%s1851_s9 + $0x290] sm:$0xff] }
  0xa6   : > { %1547 = vmatprep.mubr.msk.f32.mxu0 %vm418_vm0, %v247_v60  ;;  %1589 = vmatprep.mubr.msk.f32.mxu1 %vm418_vm0, %v331_v61  ;;  %v360_v59 = vld [vmem:[%s1851_s9 + $0x530] sm:$0xff] }
  0xa9   : > { %892 = vmatmul.mubr.f32.gmra.mrb[52].mxu0 %v246_v62  ;;  %1144 = vmatmul.mubr.f32.gmra.mrb[52].mxu1 %v330_v63 }
  0xaa   : > { %1548 = vmatprep.mubr.msk.f32.mxu0 %vm418_vm0, %v249_v0  ;;  %1590 = vmatprep.mubr.msk.f32.mxu1 %vm418_vm0, %v333_v1 }
  0xad   : > { %898 = vmatmul.mubr.f32.gmra.mrb[54].mxu0 %v248_v2  ;;  %1150 = vmatmul.mubr.f32.gmra.mrb[54].mxu1 %v332_v3 }
  0xae   : > { %1549 = vmatprep.mubr.msk.f32.mxu0 %vm418_vm0, %v251_v4  ;;  %1591 = vmatprep.mubr.msk.f32.mxu1 %vm418_vm0, %v335_v5 }
  0xb1   : > { %904 = vmatmul.mubr.f32.gmra.mrb[56].mxu0 %v250_v6  ;;  %1156 = vmatmul.mubr.f32.gmra.mrb[56].mxu1 %v334_v7 }
  0xb2   : > { %1550 = vmatprep.mubr.msk.f32.mxu0 %vm418_vm0, %v253_v8  ;;  %1592 = vmatprep.mubr.msk.f32.mxu1 %vm418_vm0, %v337_v9 }
  0xb5   : > { %910 = vmatmul.mubr.f32.gmra.mrb[58].mxu0 %v252_v10  ;;  %1162 = vmatmul.mubr.f32.gmra.mrb[58].mxu1 %v336_v11 }
  0xb6   : > { %1551 = vmatprep.mubr.msk.f32.mxu0 %vm418_vm0, %v255_v12  ;;  %1593 = vmatprep.mubr.msk.f32.mxu1 %vm418_vm0, %v339_v13 }
  0xb9   : > { %916 = vmatmul.mubr.f32.gmra.mrb[60].mxu0 %v254_v14  ;;  %1168 = vmatmul.mubr.f32.gmra.mrb[60].mxu1 %v338_v15 }
  0xba   : > { %1552 = vmatprep.mubr.msk.f32.mxu0 %vm418_vm0, %v257_v16  ;;  %1594 = vmatprep.mubr.msk.f32.mxu1 %vm418_vm0, %v341_v17 }
  0xbd   : > { %922 = vmatmul.mubr.f32.gmra.mrb[62].mxu0 %v256_v18  ;;  %1174 = vmatmul.mubr.f32.gmra.mrb[62].mxu1 %v340_v19 }
  0xbe   : > { %1553 = vmatprep.mubr.msk.f32.mxu0 %vm418_vm0, %v259_v20  ;;  %1595 = vmatprep.mubr.msk.f32.mxu1 %vm418_vm0, %v343_v21 }
  0xc1   : > { %928 = vmatmul.mubr.f32.gmra.mrb[64].mxu0 %v258_v22  ;;  %1180 = vmatmul.mubr.f32.gmra.mrb[64].mxu1 %v342_v23 }
  0xc2   : > { %1554 = vmatprep.mubr.msk.f32.mxu0 %vm418_vm0, %v261_v24  ;;  %1596 = vmatprep.mubr.msk.f32.mxu1 %vm418_vm0, %v345_v25 }
  0xc5   : > { %934 = vmatmul.mubr.f32.gmra.mrb[66].mxu0 %v260_v26  ;;  %1186 = vmatmul.mubr.f32.gmra.mrb[66].mxu1 %v344_v27 }
  0xc6   : > { %1555 = vmatprep.mubr.msk.f32.mxu0 %vm418_vm0, %v263_v28  ;;  %1597 = vmatprep.mubr.msk.f32.mxu1 %vm418_vm0, %v347_v29 }
  0xc9   : > { %940 = vmatmul.mubr.f32.gmra.mrb[68].mxu0 %v262_v30  ;;  %1192 = vmatmul.mubr.f32.gmra.mrb[68].mxu1 %v346_v31 }
  0xca   : > { %1556 = vmatprep.mubr.msk.f32.mxu0 %vm418_vm0, %v265_v32  ;;  %1598 = vmatprep.mubr.msk.f32.mxu1 %vm418_vm0, %v349_v33 }
  0xcd   : > { %946 = vmatmul.mubr.f32.gmra.mrb[70].mxu0 %v264_v34  ;;  %1198 = vmatmul.mubr.f32.gmra.mrb[70].mxu1 %v348_v35 }
  0xce   : > { %1557 = vmatprep.mubr.msk.f32.mxu0 %vm418_vm0, %v267_v36  ;;  %1599 = vmatprep.mubr.msk.f32.mxu1 %vm418_vm0, %v351_v37 }
  0xd1   : > { %952 = vmatmul.mubr.f32.gmra.mrb[72].mxu0 %v266_v38  ;;  %1204 = vmatmul.mubr.f32.gmra.mrb[72].mxu1 %v350_v39 }
  0xd2   : > { %1558 = vmatprep.mubr.msk.f32.mxu0 %vm418_vm0, %v269_v40  ;;  %1600 = vmatprep.mubr.msk.f32.mxu1 %vm418_vm0, %v353_v41 }
  0xd5   : > { %958 = vmatmul.mubr.f32.gmra.mrb[74].mxu0 %v268_v42  ;;  %1210 = vmatmul.mubr.f32.gmra.mrb[74].mxu1 %v352_v43 }
  0xd6   : > { %1559 = vmatprep.mubr.msk.f32.mxu0 %vm418_vm0, %v271_v44  ;;  %1601 = vmatprep.mubr.msk.f32.mxu1 %vm418_vm0, %v355_v45 }
  0xd9   : > { %964 = vmatmul.mubr.f32.gmra.mrb[76].mxu0 %v270_v46  ;;  %1216 = vmatmul.mubr.f32.gmra.mrb[76].mxu1 %v354_v47 }
  0xda   : > { %1560 = vmatprep.mubr.msk.f32.mxu0 %vm418_vm0, %v273_v48  ;;  %1602 = vmatprep.mubr.msk.f32.mxu1 %vm418_vm0, %v357_v49 }
  0xdd   : > { %970 = vmatmul.mubr.f32.gmra.mrb[78].mxu0 %v272_v50  ;;  %1222 = vmatmul.mubr.f32.gmra.mrb[78].mxu1 %v356_v51 }
  0xde   : > { %1561 = vmatprep.mubr.msk.f32.mxu0 %vm418_vm0, %v275_v52  ;;  %1603 = vmatprep.mubr.msk.f32.mxu1 %vm418_vm0, %v359_v53 }
  0xe1   : > { %976 = vmatmul.mubr.f32.gmra.mrb[80].mxu0 %v274_v54  ;;  %1228 = vmatmul.mubr.f32.gmra.mrb[80].mxu1 %v358_v55 }
  0xe2   : > { %1562 = vmatprep.mubr.msk.f32.mxu0 %vm418_vm0, %v277_v56  ;;  %1604 = vmatprep.mubr.msk.f32.mxu1 %vm418_vm0, %v361_v57 }
  0xe5   : > { %982 = vmatmul.mubr.f32.gmra.mrb[82].mxu0 %v276_v58  ;;  %1234 = vmatmul.mubr.f32.gmra.mrb[82].mxu1 %v360_v59 }
 0x114   : > { %v737_v60 = vpop.f32.mrb[0].mxu0  ;;  %v989_v61 = vpop.f32.mrb[0].mxu1 }
 0x115   : > { %1240 = vst [vmem:[%s2212_s17] sm:$0xff] %v737_v60  ;;  %1325 = vst [vmem:[%s2212_s17 + $0x2a0] sm:$0xff] %v989_v61  ;;  %v739_v62 = vpop.f32.mrb[1].mxu0  ;;  %v991_v63 = vpop.f32.mrb[1].mxu1 }
 0x116   : > { %1242 = vst.msk [vmem:[%s2212_s17 + $0x8] sm:$0xff] %vm1241_vm1, %v739_v62  ;;  %1326 = vst.msk [vmem:[%s2212_s17 + $0x2a8] sm:$0xff] %vm1241_vm1, %v991_v63 }
 0x118   : > { %v743_v0 = vpop.f32.mrb[2].mxu0  ;;  %v995_v1 = vpop.f32.mrb[2].mxu1 }
 0x119   : > { %1243 = vst [vmem:[%s2212_s17 + $0x10] sm:$0xff] %v743_v0  ;;  %1327 = vst [vmem:[%s2212_s17 + $0x2b0] sm:$0xff] %v995_v1  ;;  %v745_v2 = vpop.f32.mrb[3].mxu0  ;;  %v997_v3 = vpop.f32.mrb[3].mxu1 }
 0x11a   : > { %1244 = vst.msk [vmem:[%s2212_s17 + $0x18] sm:$0xff] %vm1241_vm1, %v745_v2  ;;  %1328 = vst.msk [vmem:[%s2212_s17 + $0x2b8] sm:$0xff] %vm1241_vm1, %v997_v3 }
 0x11c   : > { %v749_v4 = vpop.f32.mrb[4].mxu0  ;;  %v1001_v5 = vpop.f32.mrb[4].mxu1 }
 0x11d   : > { %1245 = vst [vmem:[%s2212_s17 + $0x20] sm:$0xff] %v749_v4  ;;  %1329 = vst [vmem:[%s2212_s17 + $0x2c0] sm:$0xff] %v1001_v5  ;;  %v751_v6 = vpop.f32.mrb[5].mxu0  ;;  %v1003_v7 = vpop.f32.mrb[5].mxu1 }
 0x11e   : > { %1246 = vst.msk [vmem:[%s2212_s17 + $0x28] sm:$0xff] %vm1241_vm1, %v751_v6  ;;  %1330 = vst.msk [vmem:[%s2212_s17 + $0x2c8] sm:$0xff] %vm1241_vm1, %v1003_v7 }
 0x120   : > { %v755_v8 = vpop.f32.mrb[6].mxu0  ;;  %v1007_v9 = vpop.f32.mrb[6].mxu1 }
 0x121   : > { %1247 = vst [vmem:[%s2212_s17 + $0x30] sm:$0xff] %v755_v8  ;;  %1331 = vst [vmem:[%s2212_s17 + $0x2d0] sm:$0xff] %v1007_v9  ;;  %v757_v10 = vpop.f32.mrb[7].mxu0  ;;  %v1009_v11 = vpop.f32.mrb[7].mxu1 }
 0x122   : > { %1248 = vst.msk [vmem:[%s2212_s17 + $0x38] sm:$0xff] %vm1241_vm1, %v757_v10  ;;  %1332 = vst.msk [vmem:[%s2212_s17 + $0x2d8] sm:$0xff] %vm1241_vm1, %v1009_v11 }
 0x124   : > { %v761_v12 = vpop.f32.mrb[8].mxu0  ;;  %v1013_v13 = vpop.f32.mrb[8].mxu1 }
 0x125   : > { %1249 = vst [vmem:[%s2212_s17 + $0x40] sm:$0xff] %v761_v12  ;;  %1333 = vst [vmem:[%s2212_s17 + $0x2e0] sm:$0xff] %v1013_v13  ;;  %v763_v14 = vpop.f32.mrb[9].mxu0  ;;  %v1015_v15 = vpop.f32.mrb[9].mxu1 }
 0x126   : > { %1250 = vst.msk [vmem:[%s2212_s17 + $0x48] sm:$0xff] %vm1241_vm1, %v763_v14  ;;  %1334 = vst.msk [vmem:[%s2212_s17 + $0x2e8] sm:$0xff] %vm1241_vm1, %v1015_v15 }
 0x128   : > { %v767_v16 = vpop.f32.mrb[10].mxu0  ;;  %v1019_v17 = vpop.f32.mrb[10].mxu1 }
 0x129   : > { %1251 = vst [vmem:[%s2212_s17 + $0x50] sm:$0xff] %v767_v16  ;;  %1335 = vst [vmem:[%s2212_s17 + $0x2f0] sm:$0xff] %v1019_v17  ;;  %v769_v18 = vpop.f32.mrb[11].mxu0  ;;  %v1021_v19 = vpop.f32.mrb[11].mxu1 }
 0x12a   : > { %1252 = vst.msk [vmem:[%s2212_s17 + $0x58] sm:$0xff] %vm1241_vm1, %v769_v18  ;;  %1336 = vst.msk [vmem:[%s2212_s17 + $0x2f8] sm:$0xff] %vm1241_vm1, %v1021_v19 }
 0x12c   : > { %v773_v20 = vpop.f32.mrb[12].mxu0  ;;  %v1025_v21 = vpop.f32.mrb[12].mxu1 }
 0x12d   : > { %1253 = vst [vmem:[%s2212_s17 + $0x60] sm:$0xff] %v773_v20  ;;  %1337 = vst [vmem:[%s2212_s17 + $0x300] sm:$0xff] %v1025_v21  ;;  %v775_v22 = vpop.f32.mrb[13].mxu0  ;;  %v1027_v23 = vpop.f32.mrb[13].mxu1 }
 0x12e   : > { %1254 = vst.msk [vmem:[%s2212_s17 + $0x68] sm:$0xff] %vm1241_vm1, %v775_v22  ;;  %1338 = vst.msk [vmem:[%s2212_s17 + $0x308] sm:$0xff] %vm1241_vm1, %v1027_v23 }
 0x130   : > { %v779_v24 = vpop.f32.mrb[14].mxu0  ;;  %v1031_v25 = vpop.f32.mrb[14].mxu1 }
 0x131   : > { %1255 = vst [vmem:[%s2212_s17 + $0x70] sm:$0xff] %v779_v24  ;;  %1339 = vst [vmem:[%s2212_s17 + $0x310] sm:$0xff] %v1031_v25  ;;  %v781_v26 = vpop.f32.mrb[15].mxu0  ;;  %v1033_v27 = vpop.f32.mrb[15].mxu1 }
 0x132   : > { %1256 = vst.msk [vmem:[%s2212_s17 + $0x78] sm:$0xff] %vm1241_vm1, %v781_v26  ;;  %1340 = vst.msk [vmem:[%s2212_s17 + $0x318] sm:$0xff] %vm1241_vm1, %v1033_v27 }
 0x134   : > { %v785_v28 = vpop.f32.mrb[16].mxu0  ;;  %v1037_v29 = vpop.f32.mrb[16].mxu1 }
 0x135   : > { %1257 = vst [vmem:[%s2212_s17 + $0x80] sm:$0xff] %v785_v28  ;;  %1341 = vst [vmem:[%s2212_s17 + $0x320] sm:$0xff] %v1037_v29  ;;  %v787_v30 = vpop.f32.mrb[17].mxu0  ;;  %v1039_v31 = vpop.f32.mrb[17].mxu1 }
 0x136   : > { %1258 = vst.msk [vmem:[%s2212_s17 + $0x88] sm:$0xff] %vm1241_vm1, %v787_v30  ;;  %1342 = vst.msk [vmem:[%s2212_s17 + $0x328] sm:$0xff] %vm1241_vm1, %v1039_v31 }
 0x138   : > { %v791_v32 = vpop.f32.mrb[18].mxu0  ;;  %v1043_v33 = vpop.f32.mrb[18].mxu1 }
 0x139   : > { %1259 = vst [vmem:[%s2212_s17 + $0x90] sm:$0xff] %v791_v32  ;;  %1343 = vst [vmem:[%s2212_s17 + $0x330] sm:$0xff] %v1043_v33  ;;  %v793_v34 = vpop.f32.mrb[19].mxu0  ;;  %v1045_v35 = vpop.f32.mrb[19].mxu1 }
 0x13a   : > { %1260 = vst.msk [vmem:[%s2212_s17 + $0x98] sm:$0xff] %vm1241_vm1, %v793_v34  ;;  %1344 = vst.msk [vmem:[%s2212_s17 + $0x338] sm:$0xff] %vm1241_vm1, %v1045_v35 }
 0x13c   : > { %v797_v36 = vpop.f32.mrb[20].mxu0  ;;  %v1049_v37 = vpop.f32.mrb[20].mxu1 }
 0x13d   : > { %1261 = vst [vmem:[%s2212_s17 + $0xa0] sm:$0xff] %v797_v36  ;;  %1345 = vst [vmem:[%s2212_s17 + $0x340] sm:$0xff] %v1049_v37  ;;  %v799_v38 = vpop.f32.mrb[21].mxu0  ;;  %v1051_v39 = vpop.f32.mrb[21].mxu1 }
 0x13e   : > { %1262 = vst.msk [vmem:[%s2212_s17 + $0xa8] sm:$0xff] %vm1241_vm1, %v799_v38  ;;  %1346 = vst.msk [vmem:[%s2212_s17 + $0x348] sm:$0xff] %vm1241_vm1, %v1051_v39 }
 0x140   : > { %v803_v40 = vpop.f32.mrb[22].mxu0  ;;  %v1055_v41 = vpop.f32.mrb[22].mxu1 }
 0x141   : > { %1263 = vst [vmem:[%s2212_s17 + $0xb0] sm:$0xff] %v803_v40  ;;  %1347 = vst [vmem:[%s2212_s17 + $0x350] sm:$0xff] %v1055_v41  ;;  %v805_v42 = vpop.f32.mrb[23].mxu0  ;;  %v1057_v43 = vpop.f32.mrb[23].mxu1 }
 0x142   : > { %1264 = vst.msk [vmem:[%s2212_s17 + $0xb8] sm:$0xff] %vm1241_vm1, %v805_v42  ;;  %1348 = vst.msk [vmem:[%s2212_s17 + $0x358] sm:$0xff] %vm1241_vm1, %v1057_v43 }
 0x144   : > { %v809_v44 = vpop.f32.mrb[24].mxu0  ;;  %v1061_v45 = vpop.f32.mrb[24].mxu1 }
 0x145   : > { %1265 = vst [vmem:[%s2212_s17 + $0xc0] sm:$0xff] %v809_v44  ;;  %1349 = vst [vmem:[%s2212_s17 + $0x360] sm:$0xff] %v1061_v45  ;;  %v811_v46 = vpop.f32.mrb[25].mxu0  ;;  %v1063_v47 = vpop.f32.mrb[25].mxu1 }
 0x146   : > { %1266 = vst.msk [vmem:[%s2212_s17 + $0xc8] sm:$0xff] %vm1241_vm1, %v811_v46  ;;  %1350 = vst.msk [vmem:[%s2212_s17 + $0x368] sm:$0xff] %vm1241_vm1, %v1063_v47 }
 0x148   : > { %v815_v48 = vpop.f32.mrb[26].mxu0  ;;  %v1067_v49 = vpop.f32.mrb[26].mxu1 }
 0x149   : > { %1267 = vst [vmem:[%s2212_s17 + $0xd0] sm:$0xff] %v815_v48  ;;  %1351 = vst [vmem:[%s2212_s17 + $0x370] sm:$0xff] %v1067_v49  ;;  %v817_v50 = vpop.f32.mrb[27].mxu0  ;;  %v1069_v51 = vpop.f32.mrb[27].mxu1 }
 0x14a   : > { %1268 = vst.msk [vmem:[%s2212_s17 + $0xd8] sm:$0xff] %vm1241_vm1, %v817_v50  ;;  %1352 = vst.msk [vmem:[%s2212_s17 + $0x378] sm:$0xff] %vm1241_vm1, %v1069_v51 }
 0x14c   : > { %v821_v52 = vpop.f32.mrb[28].mxu0  ;;  %v1073_v53 = vpop.f32.mrb[28].mxu1 }
 0x14d   : > { %1269 = vst [vmem:[%s2212_s17 + $0xe0] sm:$0xff] %v821_v52  ;;  %1353 = vst [vmem:[%s2212_s17 + $0x380] sm:$0xff] %v1073_v53  ;;  %v823_v54 = vpop.f32.mrb[29].mxu0  ;;  %v1075_v55 = vpop.f32.mrb[29].mxu1 }
 0x14e   : > { %1270 = vst.msk [vmem:[%s2212_s17 + $0xe8] sm:$0xff] %vm1241_vm1, %v823_v54  ;;  %1354 = vst.msk [vmem:[%s2212_s17 + $0x388] sm:$0xff] %vm1241_vm1, %v1075_v55 }
 0x150   : > { %v827_v56 = vpop.f32.mrb[30].mxu0  ;;  %v1079_v57 = vpop.f32.mrb[30].mxu1 }
 0x151   : > { %1271 = vst [vmem:[%s2212_s17 + $0xf0] sm:$0xff] %v827_v56  ;;  %1355 = vst [vmem:[%s2212_s17 + $0x390] sm:$0xff] %v1079_v57  ;;  %v829_v58 = vpop.f32.mrb[31].mxu0  ;;  %v1081_v59 = vpop.f32.mrb[31].mxu1 }
 0x152   : > { %1272 = vst.msk [vmem:[%s2212_s17 + $0xf8] sm:$0xff] %vm1241_vm1, %v829_v58  ;;  %1356 = vst.msk [vmem:[%s2212_s17 + $0x398] sm:$0xff] %vm1241_vm1, %v1081_v59 }
 0x154   : > { %v833_v60 = vpop.f32.mrb[32].mxu0  ;;  %v1085_v61 = vpop.f32.mrb[32].mxu1 }
 0x155   : > { %1273 = vst [vmem:[%s2212_s17 + $0x100] sm:$0xff] %v833_v60  ;;  %1357 = vst [vmem:[%s2212_s17 + $0x3a0] sm:$0xff] %v1085_v61  ;;  %v835_v62 = vpop.f32.mrb[33].mxu0  ;;  %v1087_v63 = vpop.f32.mrb[33].mxu1 }
 0x156   : > { %1274 = vst.msk [vmem:[%s2212_s17 + $0x108] sm:$0xff] %vm1241_vm1, %v835_v62  ;;  %1358 = vst.msk [vmem:[%s2212_s17 + $0x3a8] sm:$0xff] %vm1241_vm1, %v1087_v63 }
 0x158   : > { %v839_v0 = vpop.f32.mrb[34].mxu0  ;;  %v1091_v1 = vpop.f32.mrb[34].mxu1 }
 0x159   : > { %1275 = vst [vmem:[%s2212_s17 + $0x110] sm:$0xff] %v839_v0  ;;  %1359 = vst [vmem:[%s2212_s17 + $0x3b0] sm:$0xff] %v1091_v1  ;;  %v841_v2 = vpop.f32.mrb[35].mxu0  ;;  %v1093_v3 = vpop.f32.mrb[35].mxu1 }
 0x15a   : > { %1276 = vst.msk [vmem:[%s2212_s17 + $0x118] sm:$0xff] %vm1241_vm1, %v841_v2  ;;  %1360 = vst.msk [vmem:[%s2212_s17 + $0x3b8] sm:$0xff] %vm1241_vm1, %v1093_v3 }
 0x15c   : > { %v845_v4 = vpop.f32.mrb[36].mxu0  ;;  %v1097_v5 = vpop.f32.mrb[36].mxu1 }
 0x15d   : > { %1277 = vst [vmem:[%s2212_s17 + $0x120] sm:$0xff] %v845_v4  ;;  %1361 = vst [vmem:[%s2212_s17 + $0x3c0] sm:$0xff] %v1097_v5  ;;  %v847_v6 = vpop.f32.mrb[37].mxu0  ;;  %v1099_v7 = vpop.f32.mrb[37].mxu1 }
 0x15e   : > { %1278 = vst.msk [vmem:[%s2212_s17 + $0x128] sm:$0xff] %vm1241_vm1, %v847_v6  ;;  %1362 = vst.msk [vmem:[%s2212_s17 + $0x3c8] sm:$0xff] %vm1241_vm1, %v1099_v7 }
 0x160   : > { %v851_v8 = vpop.f32.mrb[38].mxu0  ;;  %v1103_v9 = vpop.f32.mrb[38].mxu1 }
 0x161   : > { %1279 = vst [vmem:[%s2212_s17 + $0x130] sm:$0xff] %v851_v8  ;;  %1363 = vst [vmem:[%s2212_s17 + $0x3d0] sm:$0xff] %v1103_v9  ;;  %v853_v10 = vpop.f32.mrb[39].mxu0  ;;  %v1105_v11 = vpop.f32.mrb[39].mxu1 }
 0x162   : > { %1280 = vst.msk [vmem:[%s2212_s17 + $0x138] sm:$0xff] %vm1241_vm1, %v853_v10  ;;  %1364 = vst.msk [vmem:[%s2212_s17 + $0x3d8] sm:$0xff] %vm1241_vm1, %v1105_v11 }
 0x164   : > { %v857_v12 = vpop.f32.mrb[40].mxu0  ;;  %v1109_v13 = vpop.f32.mrb[40].mxu1 }
 0x165   : > { %1281 = vst [vmem:[%s2212_s17 + $0x140] sm:$0xff] %v857_v12  ;;  %1365 = vst [vmem:[%s2212_s17 + $0x3e0] sm:$0xff] %v1109_v13  ;;  %v859_v14 = vpop.f32.mrb[41].mxu0  ;;  %v1111_v15 = vpop.f32.mrb[41].mxu1 }
 0x166   : > { %1282 = vst.msk [vmem:[%s2212_s17 + $0x148] sm:$0xff] %vm1241_vm1, %v859_v14  ;;  %1366 = vst.msk [vmem:[%s2212_s17 + $0x3e8] sm:$0xff] %vm1241_vm1, %v1111_v15 }
 0x168   : > { %v863_v16 = vpop.f32.mrb[42].mxu0  ;;  %v1115_v17 = vpop.f32.mrb[42].mxu1 }
 0x169   : > { %1283 = vst [vmem:[%s2212_s17 + $0x150] sm:$0xff] %v863_v16  ;;  %1367 = vst [vmem:[%s2212_s17 + $0x3f0] sm:$0xff] %v1115_v17  ;;  %v865_v18 = vpop.f32.mrb[43].mxu0  ;;  %v1117_v19 = vpop.f32.mrb[43].mxu1 }
 0x16a   : > { %1284 = vst.msk [vmem:[%s2212_s17 + $0x158] sm:$0xff] %vm1241_vm1, %v865_v18  ;;  %1368 = vst.msk [vmem:[%s2212_s17 + $0x3f8] sm:$0xff] %vm1241_vm1, %v1117_v19 }
 0x16c   : > { %v869_v20 = vpop.f32.mrb[44].mxu0  ;;  %v1121_v21 = vpop.f32.mrb[44].mxu1 }
 0x16d   : > { %1285 = vst [vmem:[%s2212_s17 + $0x160] sm:$0xff] %v869_v20  ;;  %1369 = vst [vmem:[%s2212_s17 + $0x400] sm:$0xff] %v1121_v21  ;;  %v871_v22 = vpop.f32.mrb[45].mxu0  ;;  %v1123_v23 = vpop.f32.mrb[45].mxu1 }
 0x16e   : > { %1286 = vst.msk [vmem:[%s2212_s17 + $0x168] sm:$0xff] %vm1241_vm1, %v871_v22  ;;  %1370 = vst.msk [vmem:[%s2212_s17 + $0x408] sm:$0xff] %vm1241_vm1, %v1123_v23 }
 0x170   : > { %v875_v24 = vpop.f32.mrb[46].mxu0  ;;  %v1127_v25 = vpop.f32.mrb[46].mxu1 }
 0x171   : > { %1287 = vst [vmem:[%s2212_s17 + $0x170] sm:$0xff] %v875_v24  ;;  %1371 = vst [vmem:[%s2212_s17 + $0x410] sm:$0xff] %v1127_v25  ;;  %v877_v26 = vpop.f32.mrb[47].mxu0  ;;  %v1129_v27 = vpop.f32.mrb[47].mxu1 }
 0x172   : > { %1288 = vst.msk [vmem:[%s2212_s17 + $0x178] sm:$0xff] %vm1241_vm1, %v877_v26  ;;  %1372 = vst.msk [vmem:[%s2212_s17 + $0x418] sm:$0xff] %vm1241_vm1, %v1129_v27 }
 0x174   : > { %v881_v28 = vpop.f32.mrb[48].mxu0  ;;  %v1133_v29 = vpop.f32.mrb[48].mxu1 }
 0x175   : > { %1289 = vst [vmem:[%s2212_s17 + $0x180] sm:$0xff] %v881_v28  ;;  %1373 = vst [vmem:[%s2212_s17 + $0x420] sm:$0xff] %v1133_v29  ;;  %v883_v30 = vpop.f32.mrb[49].mxu0  ;;  %v1135_v31 = vpop.f32.mrb[49].mxu1 }
 0x176   : > { %1290 = vst.msk [vmem:[%s2212_s17 + $0x188] sm:$0xff] %vm1241_vm1, %v883_v30  ;;  %1374 = vst.msk [vmem:[%s2212_s17 + $0x428] sm:$0xff] %vm1241_vm1, %v1135_v31 }
 0x178   : > { %v887_v32 = vpop.f32.mrb[50].mxu0  ;;  %v1139_v33 = vpop.f32.mrb[50].mxu1 }
 0x179   : > { %1291 = vst [vmem:[%s2212_s17 + $0x190] sm:$0xff] %v887_v32  ;;  %1375 = vst [vmem:[%s2212_s17 + $0x430] sm:$0xff] %v1139_v33  ;;  %v889_v34 = vpop.f32.mrb[51].mxu0  ;;  %v1141_v35 = vpop.f32.mrb[51].mxu1 }
 0x17a   : > { %1292 = vst.msk [vmem:[%s2212_s17 + $0x198] sm:$0xff] %vm1241_vm1, %v889_v34  ;;  %1376 = vst.msk [vmem:[%s2212_s17 + $0x438] sm:$0xff] %vm1241_vm1, %v1141_v35 }
 0x17c   : > { %v893_v36 = vpop.f32.mrb[52].mxu0  ;;  %v1145_v37 = vpop.f32.mrb[52].mxu1 }
 0x17d   : > { %1293 = vst [vmem:[%s2212_s17 + $0x1a0] sm:$0xff] %v893_v36  ;;  %1377 = vst [vmem:[%s2212_s17 + $0x440] sm:$0xff] %v1145_v37  ;;  %v895_v38 = vpop.f32.mrb[53].mxu0  ;;  %v1147_v39 = vpop.f32.mrb[53].mxu1 }
 0x17e   : > { %1294 = vst.msk [vmem:[%s2212_s17 + $0x1a8] sm:$0xff] %vm1241_vm1, %v895_v38  ;;  %1378 = vst.msk [vmem:[%s2212_s17 + $0x448] sm:$0xff] %vm1241_vm1, %v1147_v39 }
 0x180   : > { %v899_v40 = vpop.f32.mrb[54].mxu0  ;;  %v1151_v41 = vpop.f32.mrb[54].mxu1 }
 0x181   : > { %1295 = vst [vmem:[%s2212_s17 + $0x1b0] sm:$0xff] %v899_v40  ;;  %1379 = vst [vmem:[%s2212_s17 + $0x450] sm:$0xff] %v1151_v41  ;;  %v901_v42 = vpop.f32.mrb[55].mxu0  ;;  %v1153_v43 = vpop.f32.mrb[55].mxu1 }
 0x182   : > { %1296 = vst.msk [vmem:[%s2212_s17 + $0x1b8] sm:$0xff] %vm1241_vm1, %v901_v42  ;;  %1380 = vst.msk [vmem:[%s2212_s17 + $0x458] sm:$0xff] %vm1241_vm1, %v1153_v43 }
 0x184   : > { %v905_v44 = vpop.f32.mrb[56].mxu0  ;;  %v1157_v45 = vpop.f32.mrb[56].mxu1 }
 0x185   : > { %1297 = vst [vmem:[%s2212_s17 + $0x1c0] sm:$0xff] %v905_v44  ;;  %1381 = vst [vmem:[%s2212_s17 + $0x460] sm:$0xff] %v1157_v45  ;;  %v907_v46 = vpop.f32.mrb[57].mxu0  ;;  %v1159_v47 = vpop.f32.mrb[57].mxu1 }
 0x186   : > { %1298 = vst.msk [vmem:[%s2212_s17 + $0x1c8] sm:$0xff] %vm1241_vm1, %v907_v46  ;;  %1382 = vst.msk [vmem:[%s2212_s17 + $0x468] sm:$0xff] %vm1241_vm1, %v1159_v47 }
 0x188   : > { %v911_v48 = vpop.f32.mrb[58].mxu0  ;;  %v1163_v49 = vpop.f32.mrb[58].mxu1 }
 0x189   : > { %1299 = vst [vmem:[%s2212_s17 + $0x1d0] sm:$0xff] %v911_v48  ;;  %1383 = vst [vmem:[%s2212_s17 + $0x470] sm:$0xff] %v1163_v49  ;;  %v913_v50 = vpop.f32.mrb[59].mxu0  ;;  %v1165_v51 = vpop.f32.mrb[59].mxu1 }
 0x18a   : > { %1300 = vst.msk [vmem:[%s2212_s17 + $0x1d8] sm:$0xff] %vm1241_vm1, %v913_v50  ;;  %1384 = vst.msk [vmem:[%s2212_s17 + $0x478] sm:$0xff] %vm1241_vm1, %v1165_v51 }
 0x18c   : > { %v917_v52 = vpop.f32.mrb[60].mxu0  ;;  %v1169_v53 = vpop.f32.mrb[60].mxu1 }
 0x18d   : > { %1301 = vst [vmem:[%s2212_s17 + $0x1e0] sm:$0xff] %v917_v52  ;;  %1385 = vst [vmem:[%s2212_s17 + $0x480] sm:$0xff] %v1169_v53  ;;  %v919_v54 = vpop.f32.mrb[61].mxu0  ;;  %v1171_v55 = vpop.f32.mrb[61].mxu1 }
 0x18e   : > { %1302 = vst.msk [vmem:[%s2212_s17 + $0x1e8] sm:$0xff] %vm1241_vm1, %v919_v54  ;;  %1386 = vst.msk [vmem:[%s2212_s17 + $0x488] sm:$0xff] %vm1241_vm1, %v1171_v55 }
 0x190   : > { %v923_v56 = vpop.f32.mrb[62].mxu0  ;;  %v1175_v57 = vpop.f32.mrb[62].mxu1 }
 0x191   : > { %1303 = vst [vmem:[%s2212_s17 + $0x1f0] sm:$0xff] %v923_v56  ;;  %1387 = vst [vmem:[%s2212_s17 + $0x490] sm:$0xff] %v1175_v57  ;;  %v925_v58 = vpop.f32.mrb[63].mxu0  ;;  %v1177_v59 = vpop.f32.mrb[63].mxu1 }
 0x192   : > { %1304 = vst.msk [vmem:[%s2212_s17 + $0x1f8] sm:$0xff] %vm1241_vm1, %v925_v58  ;;  %1388 = vst.msk [vmem:[%s2212_s17 + $0x498] sm:$0xff] %vm1241_vm1, %v1177_v59 }
 0x194   : > { %v929_v60 = vpop.f32.mrb[64].mxu0  ;;  %v1181_v61 = vpop.f32.mrb[64].mxu1 }
 0x195   : > { %1305 = vst [vmem:[%s2212_s17 + $0x200] sm:$0xff] %v929_v60  ;;  %1389 = vst [vmem:[%s2212_s17 + $0x4a0] sm:$0xff] %v1181_v61  ;;  %v931_v62 = vpop.f32.mrb[65].mxu0  ;;  %v1183_v63 = vpop.f32.mrb[65].mxu1 }
 0x196   : > { %1306 = vst.msk [vmem:[%s2212_s17 + $0x208] sm:$0xff] %vm1241_vm1, %v931_v62  ;;  %1390 = vst.msk [vmem:[%s2212_s17 + $0x4a8] sm:$0xff] %vm1241_vm1, %v1183_v63 }
 0x198   : > { %v935_v0 = vpop.f32.mrb[66].mxu0  ;;  %v1187_v1 = vpop.f32.mrb[66].mxu1 }
 0x199   : > { %1307 = vst [vmem:[%s2212_s17 + $0x210] sm:$0xff] %v935_v0  ;;  %1391 = vst [vmem:[%s2212_s17 + $0x4b0] sm:$0xff] %v1187_v1  ;;  %v937_v2 = vpop.f32.mrb[67].mxu0  ;;  %v1189_v3 = vpop.f32.mrb[67].mxu1 }
 0x19a   : > { %1308 = vst.msk [vmem:[%s2212_s17 + $0x218] sm:$0xff] %vm1241_vm1, %v937_v2  ;;  %1392 = vst.msk [vmem:[%s2212_s17 + $0x4b8] sm:$0xff] %vm1241_vm1, %v1189_v3 }
 0x19c   : > { %v941_v4 = vpop.f32.mrb[68].mxu0  ;;  %v1193_v5 = vpop.f32.mrb[68].mxu1 }
 0x19d   : > { %1309 = vst [vmem:[%s2212_s17 + $0x220] sm:$0xff] %v941_v4  ;;  %1393 = vst [vmem:[%s2212_s17 + $0x4c0] sm:$0xff] %v1193_v5  ;;  %v943_v6 = vpop.f32.mrb[69].mxu0  ;;  %v1195_v7 = vpop.f32.mrb[69].mxu1 }
 0x19e   : > { %1310 = vst.msk [vmem:[%s2212_s17 + $0x228] sm:$0xff] %vm1241_vm1, %v943_v6  ;;  %1394 = vst.msk [vmem:[%s2212_s17 + $0x4c8] sm:$0xff] %vm1241_vm1, %v1195_v7 }
 0x1a0   : > { %v947_v8 = vpop.f32.mrb[70].mxu0  ;;  %v1199_v9 = vpop.f32.mrb[70].mxu1 }
 0x1a1   : > { %1311 = vst [vmem:[%s2212_s17 + $0x230] sm:$0xff] %v947_v8  ;;  %1395 = vst [vmem:[%s2212_s17 + $0x4d0] sm:$0xff] %v1199_v9  ;;  %v949_v10 = vpop.f32.mrb[71].mxu0  ;;  %v1201_v11 = vpop.f32.mrb[71].mxu1 }
 0x1a2   : > { %1312 = vst.msk [vmem:[%s2212_s17 + $0x238] sm:$0xff] %vm1241_vm1, %v949_v10  ;;  %1396 = vst.msk [vmem:[%s2212_s17 + $0x4d8] sm:$0xff] %vm1241_vm1, %v1201_v11 }
 0x1a4   : > { %v953_v12 = vpop.f32.mrb[72].mxu0  ;;  %v1205_v13 = vpop.f32.mrb[72].mxu1 }
 0x1a5   : > { %1313 = vst [vmem:[%s2212_s17 + $0x240] sm:$0xff] %v953_v12  ;;  %1397 = vst [vmem:[%s2212_s17 + $0x4e0] sm:$0xff] %v1205_v13  ;;  %v955_v14 = vpop.f32.mrb[73].mxu0  ;;  %v1207_v15 = vpop.f32.mrb[73].mxu1 }
 0x1a6   : > { %1314 = vst.msk [vmem:[%s2212_s17 + $0x248] sm:$0xff] %vm1241_vm1, %v955_v14  ;;  %1398 = vst.msk [vmem:[%s2212_s17 + $0x4e8] sm:$0xff] %vm1241_vm1, %v1207_v15 }
 0x1a8   : > { %v959_v16 = vpop.f32.mrb[74].mxu0  ;;  %v1211_v17 = vpop.f32.mrb[74].mxu1 }
 0x1a9   : > { %1315 = vst [vmem:[%s2212_s17 + $0x250] sm:$0xff] %v959_v16  ;;  %1399 = vst [vmem:[%s2212_s17 + $0x4f0] sm:$0xff] %v1211_v17  ;;  %v961_v18 = vpop.f32.mrb[75].mxu0  ;;  %v1213_v19 = vpop.f32.mrb[75].mxu1 }
 0x1aa   : > { %1316 = vst.msk [vmem:[%s2212_s17 + $0x258] sm:$0xff] %vm1241_vm1, %v961_v18  ;;  %1400 = vst.msk [vmem:[%s2212_s17 + $0x4f8] sm:$0xff] %vm1241_vm1, %v1213_v19 }
 0x1ac   : > { %v965_v20 = vpop.f32.mrb[76].mxu0  ;;  %v1217_v21 = vpop.f32.mrb[76].mxu1 }
 0x1ad   : > { %1317 = vst [vmem:[%s2212_s17 + $0x260] sm:$0xff] %v965_v20  ;;  %1401 = vst [vmem:[%s2212_s17 + $0x500] sm:$0xff] %v1217_v21  ;;  %v967_v22 = vpop.f32.mrb[77].mxu0  ;;  %v1219_v23 = vpop.f32.mrb[77].mxu1 }
 0x1ae   : > { %1318 = vst.msk [vmem:[%s2212_s17 + $0x268] sm:$0xff] %vm1241_vm1, %v967_v22  ;;  %1402 = vst.msk [vmem:[%s2212_s17 + $0x508] sm:$0xff] %vm1241_vm1, %v1219_v23 }
 0x1b0   : > { %v971_v24 = vpop.f32.mrb[78].mxu0  ;;  %v1223_v25 = vpop.f32.mrb[78].mxu1 }
 0x1b1   : > { %1319 = vst [vmem:[%s2212_s17 + $0x270] sm:$0xff] %v971_v24  ;;  %1403 = vst [vmem:[%s2212_s17 + $0x510] sm:$0xff] %v1223_v25  ;;  %v973_v26 = vpop.f32.mrb[79].mxu0  ;;  %v1225_v27 = vpop.f32.mrb[79].mxu1 }
 0x1b2   : > { %1320 = vst.msk [vmem:[%s2212_s17 + $0x278] sm:$0xff] %vm1241_vm1, %v973_v26  ;;  %1404 = vst.msk [vmem:[%s2212_s17 + $0x518] sm:$0xff] %vm1241_vm1, %v1225_v27 }
 0x1b4   : > { %v977_v28 = vpop.f32.mrb[80].mxu0  ;;  %v1229_v29 = vpop.f32.mrb[80].mxu1 }
 0x1b5   : > { %1321 = vst [vmem:[%s2212_s17 + $0x280] sm:$0xff] %v977_v28  ;;  %1405 = vst [vmem:[%s2212_s17 + $0x520] sm:$0xff] %v1229_v29  ;;  %v979_v30 = vpop.f32.mrb[81].mxu0  ;;  %v1231_v31 = vpop.f32.mrb[81].mxu1 }
 0x1b6   : > { %1322 = vst.msk [vmem:[%s2212_s17 + $0x288] sm:$0xff] %vm1241_vm1, %v979_v30  ;;  %1406 = vst.msk [vmem:[%s2212_s17 + $0x528] sm:$0xff] %vm1241_vm1, %v1231_v31 }
 0x1b8   : > { %v983_v32 = vpop.f32.mrb[82].mxu0  ;;  %v1235_v33 = vpop.f32.mrb[82].mxu1 }
 0x1b9   : > { %1323 = vst [vmem:[%s2212_s17 + $0x290] sm:$0xff] %v983_v32  ;;  %1407 = vst [vmem:[%s2212_s17 + $0x530] sm:$0xff] %v1235_v33  ;;  %v985_v34 = vpop.f32.mrb[83].mxu0  ;;  %v1237_v35 = vpop.f32.mrb[83].mxu1 }
 0x1ba   : > { %1324 = vst.msk [vmem:[%s2212_s17 + $0x298] sm:$0xff] %vm1241_vm1, %v985_v34  ;;  %1408 = vst.msk [vmem:[%s2212_s17 + $0x538] sm:$0xff] %vm1241_vm1, %v1237_v35 }
 0x1bb PF: > { %s12_s11 = sadd.s32 1, %s1739_s11   ;;  %s2478_s9 = smov %s1735_s10 }
 0x1bc   : > { %p9_p5 = scmp.ge.s32.totalorder %s12_s11, 4   ;;  %s2479_s10 = smov %s2481_s12 }
 0x1be   :  { %11 = sbr.rel (!%p9_p5) target bundleno = 2 (0x2), region = 61 }

</bundles_post_ra>
